<compile_context>
chip_gen: v7x
topology: tpu7x:2x2x1
jax: 0.10.0
libtpu: 0.0.40
codegen_flags: <defaults>
</compile_context>

<pallas_src>
import jax
import jax.numpy as jnp
from jax import lax
from jax.experimental import pallas as pl
from jax.experimental.pallas import tpu as pltpu

EMB_CHAR = 50
C_PAD = 64                                    # char dim padded to half a vreg
EMB_WORD = 100
KERNEL = 5
PADDING = 1
MAX_WORDS = 21

L_OUT = MAX_WORDS + 2 * PADDING - KERNEL + 1  # 19 valid conv output steps
L_OUT_P = 32                                  # padded: multiple of 16 (bf16)
L_IN_P = L_OUT_P + KERNEL - 1                 # 36 padded input time steps
KC = KERNEL * C_PAD                           # 320 im2col contraction
O_PAD = 128                                   # out channels padded to lanes
NEG_MASK = -1e30                              # "bias" for padded time rows

TB_MAX = 256                                  # max batch rows per grid step


def cnn_kernel(x_ref, w_ref, b_ref, o_ref):
    # x_ref: (TB, L_IN_P, C_PAD)  bf16  zero-padded NWC input
    # w_ref: (KC, O_PAD)          bf16  im2col weights, tap k at rows [64k, 64k+50)
    # b_ref: (1, L_OUT_P, O_PAD)  f32   bias on valid rows, -1e30 on padded rows
    # o_ref: (TB, O_PAD)          f32   output word embeddings (padded)
    tb = x_ref.shape[0]
    x = x_ref[...]

    # Lane-aligned im2col: xcol[b, t, 64k + c] = x[b, t + k, c].
    xcol = jnp.concatenate(
        [x[:, k:k + L_OUT_P, :] for k in range(KERNEL)], axis=-1)  # (TB,32,320)

    # Layout-preserving flatten (32 % 16 == 0) -> single MXU matmul, f32 acc.
    y = jnp.dot(xcol.reshape(tb * L_OUT_P, KC), w_ref[...],
                preferred_element_type=jnp.float32)
    y = y.reshape(tb, L_OUT_P, O_PAD)

    # Bias + ReLU; padded time rows see -1e30 and clamp to 0 (neutral for max).
    y = jnp.maximum(y + b_ref[...], 0.0)

    o_ref[...] = jnp.max(y, axis=1).astype(o_ref.dtype)  # max over time


def _round_up(n, m):
    return ((n + m - 1) // m) * m


@jax.jit
def cnn_forward(x_ncw, w_ock, bias):
    """x_ncw: (B, emb_char, max_words)      [PyTorch NCW]
       w_ock: (emb_word, emb_char, kernel)  [PyTorch Conv1d weight]
       bias : (emb_word,)
       returns (B, emb_word)"""
    B = x_ncw.shape[0]

    # NCW -> NWC bf16; one pad covers: 1 left conv pad + zeros right up to 36
    # time steps (32 conv output rows) and chars 50 -> 64 (lane alignment).
    x_nwc = jnp.transpose(x_ncw, (0, 2, 1)).astype(jnp.bfloat16)    # (B,21,50)
    x_nwc = jnp.pad(
        x_nwc,
        ((0, 0),
         (PADDING, L_IN_P - MAX_WORDS - PADDING),
         (0, C_PAD - EMB_CHAR)))                                    # (B,36,64)

    # Balanced batch tiling: evenly filled tiles; >= 2 tiles for moderate B so
    # both v7x TensorCores get work under dimension_semantics=("parallel",).
    num_tiles = pl.cdiv(B, TB_MAX)
    if num_tiles == 1 and B > 16:
        num_tiles = 2
    tb = _round_up(pl.cdiv(B, num_tiles), 8)
    b_padded = _round_up(B, tb)
    if b_padded != B:
        x_nwc = jnp.pad(x_nwc, ((0, b_padded - B), (0, 0), (0, 0)))

    # Weights -> single im2col matrix (320, 128); tap k at rows [64k, 64k+50).
    w_kco = jnp.transpose(w_ock, (2, 1, 0))                         # (5,50,100)
    w_kco = jnp.pad(w_kco,
                    ((0, 0), (0, C_PAD - EMB_CHAR), (0, O_PAD - EMB_WORD)))
    w_mat = w_kco.reshape(KC, O_PAD).astype(jnp.bfloat16)

    # Bias with the time mask folded in: valid rows get the bias, padded rows
    # get -1e30 so bias-add + ReLU zeroes them inside the kernel.
    bias_pad = jnp.pad(bias.astype(jnp.float32), (0, O_PAD - EMB_WORD))
    valid_row = (jnp.arange(L_OUT_P) < L_OUT)[:, None]
    b_mat = jnp.where(valid_row, bias_pad[None, :],
                      jnp.float32(NEG_MASK))[None]                  # (1,32,128)

    out = pl.pallas_call(
        cnn_kernel,
        out_shape=jax.ShapeDtypeStruct((b_padded, O_PAD), jnp.float32),
        grid_spec=pltpu.PrefetchScalarGridSpec(
            num_scalar_prefetch=0,
            grid=(b_padded // tb,),
            in_specs=[
                pl.BlockSpec((tb, L_IN_P, C_PAD), lambda i: (i, 0, 0)),
                pl.BlockSpec((KC, O_PAD), lambda i: (0, 0)),            # resident
                pl.BlockSpec((1, L_OUT_P, O_PAD), lambda i: (0, 0, 0)),  # resident
            ],
            out_specs=pl.BlockSpec((tb, O_PAD), lambda i: (i, 0)),
        ),
        compiler_params=pltpu.CompilerParams(
            dimension_semantics=("parallel",),
            vmem_limit_bytes=40 << 20),
    )(x_nwc, w_mat, b_mat)

    return out[:B, :EMB_WORD].astype(x_ncw.dtype)


def ref_forward(x_ncw, w_ock, bias):
    """Pure-JAX reference matching nn.Conv1d(pad=1) + ReLU + max(dim=2)."""
    y = lax.conv_general_dilated(
        x_ncw, w_ock, window_strides=(1,), padding=[(PADDING, PADDING)],
        dimension_numbers=("NCH", "OIH", "NCH"))
    y = jnp.maximum(y + bias[None, :, None], 0.0)
    return jnp.max(y, axis=2)


if __name__ == "__main__":
    B = 4
    key = jax.random.PRNGKey(0)
    kx, kw, kb = jax.random.split(key, 3)

    x = jax.random.normal(kx, (B, EMB_CHAR, MAX_WORDS), dtype=jnp.float32)
    # PyTorch Conv1d default init: U(-s, s), s = 1/sqrt(C*K)
    bound = 1.0 / (EMB_CHAR * KERNEL) ** 0.5
    w = jax.random.uniform(kw, (EMB_WORD, EMB_CHAR, KERNEL),
                           minval=-bound, maxval=bound, dtype=jnp.float32)
    b = jax.random.uniform(kb, (EMB_WORD,),
                           minval=-bound, maxval=bound, dtype=jnp.float32)

    out = cnn_forward(x, w, b)
    jax.block_until_ready(out)

    ref = ref_forward(x, w, b)
    assert out.shape == (B, EMB_WORD)
    # bf16 matmul inputs with f32 accumulation -> loosen tolerance vs pure f32.
    assert jnp.allclose(out, ref, atol=2e-2, rtol=2e-2)

    print("KERNEL_OK")
</pallas_src>

<mosaic_0001>
module attributes {stable_mosaic.version = 11 : i64} {
  func.func @cnn_kernel(%arg0: i32, %arg1: memref<8x36x64xbf16, #tpu.memory_space<vmem>>, %arg2: memref<320x128xbf16, #tpu.memory_space<vmem>>, %arg3: memref<1x32x128xf32, #tpu.memory_space<vmem>>, %arg4: memref<8x128xf32, #tpu.memory_space<vmem>>) attributes {dimension_semantics = [#tpu.dimension_semantics<parallel>], iteration_bounds = array<i64: 1>, scalar_prefetch = 0 : i64, scratch_operands = 0 : i64, tpu.core_type = #tpu.core_type<tc>, window_params = [{transform_indices = @transform_0, window_bounds = array<i64: 8, 36, 64>}, {pipeline_mode = #tpu.pipeline_mode<synchronous>, transform_indices = @transform_1, window_bounds = array<i64: 320, 128>}, {pipeline_mode = #tpu.pipeline_mode<synchronous>, transform_indices = @transform_2, window_bounds = array<i64: 1, 32, 128>}, {transform_indices = @transform_3, window_bounds = array<i64: 8, 128>}]} {
    %c0 = arith.constant 0 : index
    %c0_0 = arith.constant 0 : index
    %c0_1 = arith.constant 0 : index
    %0 = vector.load %arg1[%c0, %c0_0, %c0_1] : memref<8x36x64xbf16, #tpu.memory_space<vmem>>, vector<8x36x64xbf16>
    %1 = vector.extract_strided_slice %0 {offsets = [0, 0, 0], sizes = [8, 32, 64], strides = [1, 1, 1]} : vector<8x36x64xbf16> to vector<8x32x64xbf16>
    %2 = vector.extract_strided_slice %0 {offsets = [0, 1, 0], sizes = [8, 32, 64], strides = [1, 1, 1]} : vector<8x36x64xbf16> to vector<8x32x64xbf16>
    %3 = vector.extract_strided_slice %0 {offsets = [0, 2, 0], sizes = [8, 32, 64], strides = [1, 1, 1]} : vector<8x36x64xbf16> to vector<8x32x64xbf16>
    %4 = vector.extract_strided_slice %0 {offsets = [0, 3, 0], sizes = [8, 32, 64], strides = [1, 1, 1]} : vector<8x36x64xbf16> to vector<8x32x64xbf16>
    %5 = vector.extract_strided_slice %0 {offsets = [0, 4, 0], sizes = [8, 32, 64], strides = [1, 1, 1]} : vector<8x36x64xbf16> to vector<8x32x64xbf16>
    %6 = tpu.concatenate %1, %2, %3, %4, %5 in 2 : vector<8x32x64xbf16>, vector<8x32x64xbf16>, vector<8x32x64xbf16>, vector<8x32x64xbf16>, vector<8x32x64xbf16> -> vector<8x32x320xbf16>
    %7 = vector.shape_cast %6 : vector<8x32x320xbf16> to vector<256x320xbf16>
    %c0_2 = arith.constant 0 : index
    %c0_3 = arith.constant 0 : index
    %8 = vector.load %arg2[%c0_2, %c0_3] : memref<320x128xbf16, #tpu.memory_space<vmem>>, vector<320x128xbf16>
    %cst = arith.constant dense<0.000000e+00> : vector<256x128xf32>
    %9 = tpu.matmul %7, %8, %cst {dimension_numbers = #tpu.dot_dimension_numbers<[1], [0], [0], [1], [0, 0, 1, 1], [], []>} : vector<256x320xbf16>, vector<320x128xbf16>, vector<256x128xf32> -> vector<256x128xf32>
    %10 = vector.shape_cast %9 : vector<256x128xf32> to vector<8x32x128xf32>
    %c0_4 = arith.constant 0 : index
    %c0_5 = arith.constant 0 : index
    %c0_6 = arith.constant 0 : index
    %11 = vector.load %arg3[%c0_4, %c0_5, %c0_6] : memref<1x32x128xf32, #tpu.memory_space<vmem>>, vector<1x32x128xf32>
    %12 = vector.broadcast %11 : vector<1x32x128xf32> to vector<8x32x128xf32>
    %13 = arith.addf %10, %12 : vector<8x32x128xf32>
    %cst_7 = arith.constant 0.000000e+00 : f32
    %14 = vector.broadcast %cst_7 : f32 to vector<8x32x128xf32>
    %15 = arith.maximumf %13, %14 : vector<8x32x128xf32>
    %cst_8 = arith.constant dense<0xFF800000> : vector<8x128xf32>
    %16 = vector.multi_reduction <maximumf>, %15, %cst_8 [1] : vector<8x32x128xf32> to vector<8x128xf32>
    %c0_9 = arith.constant 0 : index
    %c0_10 = arith.constant 0 : index
    %17 = vector.load %arg4[%c0_9, %c0_10] : memref<8x128xf32, #tpu.memory_space<vmem>>, vector<8x128xf32>
    tpu.vector_store %arg4[%c0_9, %c0_10], %16 {strides = array<i32>} : memref<8x128xf32, #tpu.memory_space<vmem>>, vector<8x128xf32>,
    return
  }
  func.func @transform_0(%arg0: i32) -> (i32, i32, i32) {
    %c0_i32 = arith.constant 0 : i32
    %c0_i32_0 = arith.constant 0 : i32
    %c0_i32_1 = arith.constant 0 : i32
    return %arg0, %c0_i32, %c0_i32_0 : i32, i32, i32
  }
  func.func @transform_1(%arg0: i32) -> (i32, i32) {
    %c0_i32 = arith.constant 0 : i32
    %c0_i32_0 = arith.constant 0 : i32
    %c0_i32_1 = arith.constant 0 : i32
    return %c0_i32, %c0_i32_0 : i32, i32
  }
  func.func @transform_2(%arg0: i32) -> (i32, i32, i32) {
    %c0_i32 = arith.constant 0 : i32
    %c0_i32_0 = arith.constant 0 : i32
    %c0_i32_1 = arith.constant 0 : i32
    %c0_i32_2 = arith.constant 0 : i32
    return %c0_i32, %c0_i32_0, %c0_i32_1 : i32, i32, i32
  }
  func.func @transform_3(%arg0: i32) -> (i32, i32) {
    %c0_i32 = arith.constant 0 : i32
    %c0_i32_0 = arith.constant 0 : i32
    return %arg0, %c0_i32 : i32, i32
  }
}

</mosaic_0001>

<bundles_post_ra>
// kernel: cnn_forward.1
= control target key start
LH: loop header
LB: loop body
LE: loop exit
PB: predicated region body
PF: predicated region fallthrough
CT: control target
= control target key end

     0   :  { %vm393_vm0 = vsmask.f32 6400  ;;  %vm159_vm1 = vsmask.f32 7424  ;;  %s1678_s26 = smov 64   ;;  %vm352_vm2 = vcmask 1046528   ;;  %s2253_s0 = inlined_call_operand.vmem [shape: bf16[8,36,64], index: 0, kind: input, shape index: {}]   ;;  %s2254_s1 = inlined_call_operand.vmem [shape: bf16[320,128], index: 1, kind: input, shape index: {}]   ;;  %s2255_s2 = inlined_call_operand.vmem [shape: f32[1,32,128], index: 2, kind: input, shape index: {}]   ;;  %s2256_s3 = inlined_call_operand.vmem [shape: f32[8,128], index: 3, kind: output, shape index: {}]  }
   0x1   :  { %v1702_v0 = vld [vmem:[%s2253_s0] sm:$0xff]   ;;  %v1707_v1 = vld [vmem:[%s2253_s0 + $0x8] sm:$0xff]   ;;  %v1716_v6 = vld [vmem:[%s2253_s0 + $0x78] sm:$0xff]   ;;  %vm571_vm3 = vcmask 523264   ;;  %vm530_vm4 = vcmask 1045504   ;;  %vm1362_vm5 = vcmask 1041409  }
   0x2   :  { %v161_v2 = vshrl.u32 %v1702_v0, 16  ;;  %v163_v3 = vshll.u32 %v1702_v0, 16  ;;  %v168_v4 = vshll.u32 %v1707_v1, 16  ;;  %v172_v5 = vshrl.u32 %v1707_v1, 16  ;;  %v1721_v7 = vld [vmem:[%s2253_s0 + $0x80] sm:$0xff]   ;;  %v1741_v30 = vld [vmem:[%s2253_s0 + $0x14] sm:$0xff]  }
   0x3   :  { %v281_v14 = vshrl.u32 %v1716_v6, 16  ;;  %v283_v15 = vshll.u32 %v1716_v6, 16  ;;  %v288_v18 = vshll.u32 %v1721_v7, 16  ;;  %v292_v19 = vshrl.u32 %v1721_v7, 16  ;;  %v1749_v35 = vld [vmem:[%s2253_s0 + $0x1c] sm:$0xff]   ;;  %v1758_v40 = vld [vmem:[%s2253_s0 + $0x8c] sm:$0xff]  }
   0x4   :  { %v394_v8 = vrot.slane %v161_v2, 1  ;;  %v395_v9 = vrot.slane %v163_v3, 2  ;;  %v397_v10 = vrot.slane %v172_v5, 1  ;;  %v398_v11 = vrot.slane %v168_v4, 2  ;;  %v1765_v49 = vld [vmem:[%s2253_s0 + $0x94] sm:$0xff]  }
   0x5   :  { %v165_v12 = vrot.slane %v163_v3, 1  ;;  %v170_v13 = vrot.slane %v168_v4, 1  ;;  %v1730_v20 = vld [vmem:[%s2253_s0 + $0x10] ss:$0 sps:$4 sm:$0x33]   ;;  %v472_v22 = vrot.slane %v281_v14, 1 }
   0x6   :  { %v396_v16 = vor.u32 %v395_v9, %v394_v8  ;;  %v399_v17 = vor.u32 %v398_v11, %v397_v10  ;;  %v473_v23 = vrot.slane %v283_v15, 2  ;;  %v285_v24 = vrot.slane %v283_v15, 1  ;;  %v1735_v25 = vld [vmem:[%s2253_s0 + $0x88] ss:$0 sps:$4 sm:$0x33]  }
   0x7   :  { %v166_v21 = vor.u32 %v165_v12, %v161_v2  ;;  %v475_v27 = vrot.slane %v292_v19, 1  ;;  %v476_v28 = vrot.slane %v288_v18, 2  ;;  %v290_v29 = vrot.slane %v288_v18, 1  ;;  %v1778_v61 = vld [vmem:[%s2253_s0 + $0x24] ss:$0 sps:$4 sm:$0x33]  }
   0x8   :  { %v400_v26 = vsel %vm393_vm0, %v396_v16, %v399_v17  ;;  %v474_v32 = vor.u32 %v473_v23, %v472_v22  ;;  %v286_v33 = vor.u32 %v285_v24, %v281_v14  ;;  %v176_v34 = vshll.u32 %v1730_v20, 16  ;;  %v1785_v4 = vld [vmem:[%s2253_s0 + $0x9c] ss:$0 sps:$4 sm:$0x33]   ;;  %v1797_v24 = vld [vmem:[%s2253_s0 + $0x28] sm:$0xff]  }
   0x9   :  { %498 = vrot.lane.b32.xlu0 %v400_v26, %s1678_s26  ;;  %v171_v31 = vsel %vm159_vm1, %v166_v21, %v170_v13  ;;  %v477_v36 = vor.u32 %v476_v28, %v475_v27  ;;  %v401_v37 = vshrl.u32 %v1730_v20, 16  ;;  %v296_v38 = vshll.u32 %v1735_v25, 16  ;;  %v1802_v26 = vld [vmem:[%s2253_s0 + $0x30] sm:$0xff]  }
   0xa   :  { %320 = vrot.lane.b32.xlu1 %v171_v31, %s1678_s26  ;;  %v479_v39 = vshrl.u32 %v1735_v25, 16  ;;  %v291_v41 = vsel %vm159_vm1, %v286_v33, %v290_v29  ;;  %v404_v42 = vrot.slane %v176_v34, 2  ;;  %v174_v43 = vor.u32 %v172_v5, %v170_v13 }
   0xb   :  { %v178_v44 = vrot.slane %v176_v34, 1  ;;  %v478_v45 = vsel %vm393_vm0, %v474_v32, %v477_v36  ;;  %v403_v46 = vrot.slane %v401_v37, 1  ;;  %v482_v48 = vrot.slane %v296_v38, 2 }
   0xc   :  { %v481_v47 = vrot.slane %v479_v39, 1  ;;  %v294_v50 = vor.u32 %v292_v19, %v290_v29  ;;  %v298_v51 = vrot.slane %v296_v38, 1  ;;  %v181_v52 = vshrl.u32 %v1741_v30, 16 }
   0xd   :  { %522 = vrot.lane.b32.xlu0 %v478_v45, %s1678_s26  ;;  %v405_v53 = vor.u32 %v404_v42, %v403_v46  ;;  %v183_v55 = vshll.u32 %v1741_v30, 16  ;;  %v188_v56 = vshll.u32 %v1749_v35, 16  ;;  %v179_v57 = vsel %vm159_vm1, %v174_v43, %v178_v44  ;;  %v1814_v42 = vld [vmem:[%s2253_s0 + $0x38] ss:$0 sps:$4 sm:$0x33]  }
   0xe   :  { %344 = vrot.lane.b32.xlu1 %v291_v41, %s1678_s26  ;;  %v483_v54 = vor.u32 %v482_v48, %v481_v47  ;;  %v192_v58 = vshrl.u32 %v1749_v35, 16  ;;  %v407_v59 = vrot.slane %v181_v52, 1  ;;  %v301_v60 = vshrl.u32 %v1758_v40, 16 }
   0xf   :  { %v406_v62 = vsel %vm393_vm0, %v399_v17, %v405_v53  ;;  %v408_v2 = vrot.slane %v183_v55, 2  ;;  %v411_v3 = vrot.slane %v188_v56, 2  ;;  %v303_v8 = vshll.u32 %v1758_v40, 16 }
  0x10   :  { %v484_v63 = vsel %vm393_vm0, %v477_v36, %v483_v54  ;;  %v410_v5 = vrot.slane %v192_v58, 1  ;;  %v308_v9 = vshll.u32 %v1765_v49, 16  ;;  %v312_v10 = vshrl.u32 %v1765_v49, 16 }
  0x11   :  { %500 = vrot.lane.b32.xlu0 %v406_v62, %s1678_s26  ;;  %v299_v11 = vsel %vm159_vm1, %v294_v50, %v298_v51  ;;  %v409_v12 = vor.u32 %v408_v2, %v407_v59  ;;  %v485_v13 = vrot.slane %v301_v60, 1  ;;  %v185_v14 = vrot.slane %v183_v55, 1  ;;  %v1826_v51 = vld [vmem:[%s2253_s0 + $0x3c] sm:$0xff]   ;;  %v1835_v62 = vld [vmem:[%s2253_s0 + $0x44] sm:$0xff]  }
  0x12   :  { %524 = vrot.lane.b32.xlu1 %v484_v63, %s1678_s26  ;;  %v412_v15 = vor.u32 %v411_v3, %v410_v5  ;;  %v486_v16 = vrot.slane %v303_v8, 2  ;;  %v488_v17 = vrot.slane %v312_v10, 1  ;;  %v489_v18 = vrot.slane %v308_v9, 2  ;;  %v1654_v55 = vld [vmem:[%s2254_s1 + $0x40] sm:$0xff]  }
  0x13   :  { %v186_v19 = vor.u32 %v185_v14, %v181_v52  ;;  %v190_v21 = vrot.slane %v188_v56, 1  ;;  %v305_v22 = vrot.slane %v303_v8, 1  ;;  %v196_v23 = vshll.u32 %v1778_v61, 16  ;;  %1442 = vmatprep.subr.bf16.mxu0 %v1654_v55  ;;  %1614 = vmatprep.subr.bf16.mxu1 %v1654_v55  ;;  %v1656_v14 = vld [vmem:[%s2254_s1 + $0x48] sm:$0xff]  }
  0x14   :  { %v487_v27 = vor.u32 %v486_v16, %v485_v13  ;;  %v490_v28 = vor.u32 %v489_v18, %v488_v17  ;;  %v310_v29 = vrot.slane %v308_v9, 1  ;;  %v414_v31 = vshrl.u32 %v1778_v61, 16  ;;  %v1655_v9 = vld [vmem:[%s2254_s1] sm:$0xff]   ;;  %v1852_v13 = vld [vmem:[%s2253_s0 + $0x4c] ss:$0 sps:$4 sm:$0x33]  }
  0x15   :  { %322 = vrot.lane.b32.xlu0 %v179_v57, %s1678_s26  ;;  %v413_v32 = vsel %vm393_vm0, %v409_v12, %v412_v15  ;;  %v417_v33 = vrot.slane %v196_v23, 2  ;;  %v316_v34 = vshll.u32 %v1785_v4, 16  ;;  %v306_v37 = vor.u32 %v305_v22, %v301_v60  ;;  %1443 = vmatpush3.bf16.msra.mxu0 %v1655_v9 }
  0x16   :  { %346 = vrot.lane.b32.xlu1 %v299_v11, %s1678_s26  ;;  %v491_v36 = vsel %vm393_vm0, %v487_v27, %v490_v28  ;;  %v416_v38 = vrot.slane %v414_v31, 1  ;;  %v492_v39 = vshrl.u32 %v1785_v4, 16  ;;  %v191_v43 = vsel %vm159_vm1, %v186_v19, %v190_v21  ;;  %1622 = vmatpush3.bf16.msra.mxu1 %v1655_v9 }
  0x17   :  { %v495_v41 = vrot.slane %v316_v34, 2  ;;  %v201_v45 = vshrl.u32 %v1797_v24, 16  ;;  %v203_v47 = vshll.u32 %v1797_v24, 16  ;;  %v208_v48 = vshll.u32 %v1802_v26, 16  ;;  %1444 = vmatprep.subr.bf16.mxu0 %v1656_v14  ;;  %1615 = vmatprep.subr.bf16.mxu1 %v1656_v14 }
  0x18   :  { %v494_v44 = vrot.slane %v492_v39, 1  ;;  %v418_v46 = vor.u32 %v417_v33, %v416_v38  ;;  %v212_v50 = vshrl.u32 %v1802_v26, 16  ;;  %v311_v52 = vsel %vm159_vm1, %v306_v37, %v310_v29  ;;  %v1659_v37 = vld [vmem:[%s2254_s1 + $0x50] sm:$0xff]  }
  0x19   :  { %502 = vrot.lane.b32.xlu0 %v413_v32, %s1678_s26  ;;  %v194_v54 = vor.u32 %v192_v58, %v190_v21  ;;  %v198_v56 = vrot.slane %v196_v23, 1  ;;  %v314_v57 = vor.u32 %v312_v10, %v310_v29  ;;  %v318_v59 = vrot.slane %v316_v34, 1  ;;  %v1657_v34 = vld [vmem:[%s2254_s1 + $0x8] sm:$0xff]  }
  0x1a   :  { %526 = vrot.lane.b32.xlu1 %v491_v36, %s1678_s26  ;;  %v496_v53 = vor.u32 %v495_v41, %v494_v44  ;;  %v420_v60 = vrot.slane %v201_v45, 1  ;;  %v421_v63 = vrot.slane %v203_v47, 2  ;;  %v423_v2 = vrot.slane %v212_v50, 1  ;;  %1445 = vmatpush3.bf16.msra.mxu0 %v1657_v34 }
  0x1b   :  { %v424_v58 = vrot.slane %v208_v48, 2  ;;  %v216_v3 = vshll.u32 %v1814_v42, 16  ;;  %v419_v5 = vsel %vm393_vm0, %v412_v15, %v418_v46  ;;  %v427_v8 = vshrl.u32 %v1814_v42, 16  ;;  %1623 = vmatpush3.bf16.msra.mxu1 %v1657_v34  ;;  %1446 = vmatprep.subr.bf16.mxu0 %v1659_v37 }
  0x1c   :  { %v497_v10 = vsel %vm393_vm0, %v490_v28, %v496_v53  ;;  %v205_v11 = vrot.slane %v203_v47, 1  ;;  %v221_v12 = vshrl.u32 %v1826_v51, 16  ;;  %v223_v15 = vshll.u32 %v1826_v51, 16  ;;  %v1867_v28 = vld [vmem:[%s2253_s0 + $0x50] sm:$0xff]   ;;  %v1888_v47 = vld [vmem:[%s2253_s0 + $0x58] sm:$0xff]   ;;  %1616 = vmatprep.subr.bf16.mxu1 %v1659_v37 }
  0x1d   :  { %324 = vrot.lane.b32.xlu0 %v191_v43, %s1678_s26  ;;  %v228_v16 = vshll.u32 %v1835_v62, 16  ;;  %v199_v17 = vsel %vm159_vm1, %v194_v54, %v198_v56  ;;  %v319_v18 = vsel %vm159_vm1, %v314_v57, %v318_v59  ;;  %v232_v19 = vshrl.u32 %v1835_v62, 16  ;;  %v1660_v43 = vld [vmem:[%s2254_s1 + $0x10] sm:$0xff]   ;;  %v1661_v54 = vld [vmem:[%s2254_s1 + $0x58] sm:$0xff]  }
  0x1e   :  { %348 = vrot.lane.b32.xlu1 %v311_v52, %s1678_s26  ;;  %v422_v21 = vor.u32 %v421_v63, %v420_v60  ;;  %v425_v22 = vor.u32 %v424_v58, %v423_v2  ;;  %v429_v23 = vrot.slane %v427_v8, 1  ;;  %v430_v27 = vrot.slane %v216_v3, 2  ;;  %v1900_v57 = vld [vmem:[%s2253_s0 + $0x60] ss:$0 sps:$4 sm:$0x33]   ;;  %v1907_v2 = vld [vmem:[%s2253_s0 + $0x64] sm:$0xff]   ;;  %1447 = vmatpush3.bf16.msra.mxu0 %v1660_v43 }
  0x1f   :  { %v206_v29 = vor.u32 %v205_v11, %v201_v45  ;;  %v210_v31 = vrot.slane %v208_v48, 1  ;;  %v433_v32 = vrot.slane %v221_v12, 1  ;;  %v434_v33 = vrot.slane %v223_v15, 2  ;;  %v1662_v58 = vld [vmem:[%s2254_s1 + $0x18] sm:$0xff]   ;;  %1624 = vmatpush3.bf16.msra.mxu1 %v1660_v43  ;;  %1448 = vmatprep.subr.bf16.mxu0 %v1661_v54 }
  0x20   :  { %v437_v36 = vrot.slane %v228_v16, 2  ;;  %v436_v38 = vrot.slane %v232_v19, 1  ;;  %v236_v39 = vshll.u32 %v1852_v13, 16  ;;  %v440_v41 = vshrl.u32 %v1852_v13, 16  ;;  %1617 = vmatprep.subr.bf16.mxu1 %v1661_v54 }
  0x21   :  { %504 = vrot.lane.b32.xlu0 %v419_v5, %s1678_s26  ;;  %v426_v44 = vsel %vm393_vm0, %v422_v21, %v425_v22  ;;  %v431_v45 = vor.u32 %v430_v27, %v429_v23  ;;  %v218_v46 = vrot.slane %v216_v3, 1  ;;  %v211_v48 = vsel %vm159_vm1, %v206_v29, %v210_v31  ;;  %v1664_v27 = vld [vmem:[%s2254_s1 + $0x20] sm:$0xff]  }
  0x22   :  { %528 = vrot.lane.b32.xlu1 %v497_v10, %s1678_s26  ;;  %v214_v52 = vor.u32 %v212_v50, %v210_v31  ;;  %v225_v53 = vrot.slane %v223_v15, 1  ;;  %v435_v55 = vor.u32 %v434_v33, %v433_v32  ;;  %v241_v56 = vshrl.u32 %v1867_v28, 16  ;;  %v1920_v15 = vld [vmem:[%s2253_s0 + $0x6c] sm:$0xff]   ;;  %1449 = vmatpush3.bf16.msra.mxu0 %v1662_v58 }
  0x23   :  { %v438_v59 = vor.u32 %v437_v36, %v436_v38  ;;  %v442_v60 = vrot.slane %v440_v41, 1  ;;  %v443_v50 = vrot.slane %v236_v39, 2  ;;  %v243_v63 = vshll.u32 %v1867_v28, 16  ;;  %1625 = vmatpush3.bf16.msra.mxu1 %v1662_v58  ;;  %v1665_v38 = vld [vmem:[%s2254_s1 + $0x68] sm:$0xff]  }
  0x24   :  { %v432_v3 = vsel %vm393_vm0, %v425_v22, %v431_v45  ;;  %v248_v5 = vshll.u32 %v1888_v47, 16  ;;  %v252_v8 = vshrl.u32 %v1888_v47, 16  ;;  %v219_v9 = vsel %vm159_vm1, %v214_v52, %v218_v46  ;;  %v1666_v45 = vld [vmem:[%s2254_s1 + $0x28] sm:$0xff]  }
  0x25   :  { %326 = vrot.lane.b32.xlu0 %v199_v17, %s1678_s26  ;;  %v226_v10 = vor.u32 %v225_v53, %v221_v12  ;;  %v230_v11 = vrot.slane %v228_v16, 1  ;;  %v238_v14 = vrot.slane %v236_v39, 1  ;;  %v1663_v17 = vld [vmem:[%s2254_s1 + $0x60] sm:$0xff]   ;;  %v256_v21 = vshll.u32 %v1900_v57, 16 }
  0x26   :  { %350 = vrot.lane.b32.xlu1 %v319_v18, %s1678_s26  ;;  %v446_v18 = vrot.slane %v241_v56, 1  ;;  %v439_v12 = vsel %vm393_vm0, %v435_v55, %v438_v59  ;;  %v444_v16 = vor.u32 %v443_v50, %v442_v60  ;;  %v453_v23 = vshrl.u32 %v1900_v57, 16  ;;  %1450 = vmatprep.subr.bf16.mxu0 %v1663_v17  ;;  %v1947_v39 = vld [vmem:[%s2253_s0 + $0x74] ss:$0 sps:$4 sm:$0x33]  }
  0x27   :  { %v234_v22 = vor.u32 %v232_v19, %v230_v11  ;;  %v447_v29 = vrot.slane %v243_v63, 2  ;;  %v449_v31 = vrot.slane %v252_v8, 1  ;;  %v450_v32 = vrot.slane %v248_v5, 2  ;;  %1618 = vmatprep.subr.bf16.mxu1 %v1663_v17  ;;  %1451 = vmatpush3.bf16.msra.mxu0 %v1664_v27  ;;  %v1667_v50 = vld [vmem:[%s2254_s1 + $0x70] sm:$0xff]  }
  0x28   :  { %v245_v33 = vrot.slane %v243_v63, 1  ;;  %v231_v34 = vsel %vm159_vm1, %v226_v10, %v230_v11  ;;  %v261_v19 = vshrl.u32 %v1907_v2, 16  ;;  %v263_v36 = vshll.u32 %v1907_v2, 16  ;;  %1626 = vmatpush3.bf16.msra.mxu1 %v1664_v27  ;;  %1452 = vmatprep.subr.bf16.mxu0 %v1665_v38 }
  0x29   :  { %506 = vrot.lane.b32.xlu0 %v426_v44, %s1678_s26  ;;  %v268_v37 = vshll.u32 %v1920_v15, 16  ;;  %v455_v41 = vrot.slane %v453_v23, 1  ;;  %v456_v43 = vrot.slane %v256_v21, 2  ;;  %v272_v44 = vshrl.u32 %v1920_v15, 16  ;;  %1619 = vmatprep.subr.bf16.mxu1 %v1665_v38 }
  0x2a   :  { %328 = vrot.lane.b32.xlu1 %v211_v48, %s1678_s26  ;;  %v445_v46 = vsel %vm393_vm0, %v438_v59, %v444_v16  ;;  %v448_v48 = vor.u32 %v447_v29, %v446_v18  ;;  %v451_v52 = vor.u32 %v450_v32, %v449_v31  ;;  %v250_v53 = vrot.slane %v248_v5, 1  ;;  %v1668_v5 = vld [vmem:[%s2254_s1 + $0x30] sm:$0xff]  }
  0x2b   :  { %v239_v54 = vsel %vm159_vm1, %v234_v22, %v238_v14  ;;  %v246_v55 = vor.u32 %v245_v33, %v241_v56  ;;  %v459_v60 = vrot.slane %v261_v19, 1  ;;  %v460_v63 = vrot.slane %v263_v36, 2  ;;  %1453 = vmatpush3.bf16.msra.mxu0 %v1666_v45  ;;  %v1670_v22 = vld [vmem:[%s2254_s1 + $0x38] sm:$0xff]   ;;  %v1671_v33 = vld [vmem:[%s2254_s1 + $0x80] sm:$0xff]  }
  0x2c   :  { %v463_v58 = vrot.slane %v268_v37, 2  ;;  %v462_v59 = vrot.slane %v272_v44, 1  ;;  %v452_v56 = vsel %vm393_vm0, %v448_v48, %v451_v52  ;;  %v466_v10 = vshrl.u32 %v1947_v39, 16  ;;  %1627 = vmatpush3.bf16.msra.mxu1 %v1666_v45  ;;  %1454 = vmatprep.subr.bf16.mxu0 %v1667_v50 }
  0x2d   :  { %508 = vrot.lane.b32.xlu0 %v432_v3, %s1678_s26  ;;  %v457_v3 = vor.u32 %v456_v43, %v455_v41  ;;  %v251_v11 = vsel %vm159_vm1, %v246_v55, %v250_v53  ;;  %v254_v14 = vor.u32 %v252_v8, %v250_v53  ;;  %v258_v17 = vrot.slane %v256_v21, 1  ;;  %1620 = vmatprep.subr.bf16.mxu1 %v1667_v50 }
  0x2e   :  { %330 = vrot.lane.b32.xlu1 %v219_v9, %s1678_s26  ;;  %v276_v9 = vshll.u32 %v1947_v39, 16  ;;  %v265_v18 = vrot.slane %v263_v36, 1  ;;  %v461_v8 = vor.u32 %v460_v63, %v459_v60  ;;  %v464_v21 = vor.u32 %v463_v58, %v462_v59 }
  0x2f   :  { %v458_v16 = vsel %vm393_vm0, %v451_v52, %v457_v3  ;;  %1455 = vmatpush3.bf16.msra.mxu0 %v1668_v5  ;;  %v468_v23 = vrot.slane %v466_v10, 1  ;;  %v259_v29 = vsel %vm159_vm1, %v254_v14, %v258_v17  ;;  %v270_v32 = vrot.slane %v268_v37, 1 }
  0x30   :  { %v469_v27 = vrot.slane %v276_v9, 2  ;;  %1628 = vmatpush3.bf16.msra.mxu1 %v1668_v5  ;;  %v266_v31 = vor.u32 %v265_v18, %v261_v19  ;;  %v278_v19 = vrot.slane %v276_v9, 1  ;;  %v374_v45 = vrot.slane %v1888_v47, 1  ;;  %v1672_v18 = vld [vmem:[%s2254_s1 + $0x88] sm:$0xff]  }
  0x31   :  { %510 = vrot.lane.b32.xlu0 %v439_v12, %s1678_s26  ;;  %v1669_v12 = vld [vmem:[%s2254_s1 + $0x78] sm:$0xff]   ;;  %v274_v41 = vor.u32 %v272_v44, %v270_v32  ;;  %v379_v48 = vrot.slane %v1920_v15, 1  ;;  %v381_v52 = vrot.slane %v1947_v39, 1  ;;  %v354_v55 = vrot.slane %v1707_v1, 1 }
  0x32   :  { %332 = vrot.lane.b32.xlu1 %v231_v34, %s1678_s26  ;;  %1456 = vmatprep.subr.bf16.mxu0 %v1669_v12  ;;  %v465_v34 = vsel %vm393_vm0, %v461_v8, %v464_v21  ;;  %v470_v36 = vor.u32 %v469_v27, %v468_v23  ;;  %v271_v38 = vsel %vm159_vm1, %v266_v31, %v270_v32  ;;  %v383_v50 = vrot.slane %v1716_v6, 1  ;;  %v1673_v23 = vld [vmem:[%s2254_s1 + $0x90] sm:$0xff]  }
  0x33   :  { %1621 = vmatprep.subr.bf16.mxu1 %v1669_v12  ;;  %1457 = vmatpush3.bf16.msra.mxu0 %v1670_v22  ;;  %v279_v43 = vsel %vm159_vm1, %v274_v41, %v278_v19  ;;  %v2006_v53 = vsel %vm352_vm2, %v379_v48, %v381_v52  ;;  %v384_v63 = vrot.slane %v1721_v7, 1  ;;  %v356_v9 = vrot.slane %v1730_v20, 1 }
  0x34   :  { %1629 = vmatpush3.bf16.msra.mxu1 %v1670_v22  ;;  %v471_v37 = vsel %vm393_vm0, %v464_v21, %v470_v36  ;;  %v386_v10 = vrot.slane %v1735_v25, 1  ;;  %v388_v31 = vrot.slane %v1758_v40, 1  ;;  %v389_v32 = vrot.slane %v1765_v49, 1 }
  0x35   :  { %512 = vrot.lane.b32.xlu0 %v445_v46, %s1678_s26  ;;  %1574 = vmatprep.subr.bf16.mxu1 %v1671_v33  ;;  %v376_v46 = vrot.slane %v1900_v57, 1  ;;  %vm1364_vm6 = vcmask 1042434   ;;  %vm1366_vm7 = vcmask 1043459   ;;  %vm1368_vm8 = vcmask 1044484  }
  0x36   :  { %334 = vrot.lane.b32.xlu1 %v239_v54, %s1678_s26  ;;  %v353_v54 = vrot.slane %v1702_v0, 1  ;;  %v387_v22 = vsel %vm352_vm2, %v384_v63, %v386_v10  ;;  %v531_v10 = vrot.slane %v1702_v0, 2  ;;  %vm1370_vm9 = vcmask 1045509  }
  0x37   :  { %v1998_v44 = vsel %vm352_vm2, %v374_v45, %v376_v46  ;;  %vm1372_vm10 = vcmask 1046534   ;;  %vm1374_vm11 = vcmask 1047559  }
  0x38   :  { %v355_v60 = vsel %vm352_vm2, %v353_v54, %v354_v55 }
  0x39   :  { %514 = vrot.lane.b32.xlu0 %v452_v56, %s1678_s26  ;;  %v385_v56 = vsel %vm352_vm2, %v383_v50, %v384_v63 }
  0x3a   :  { %336 = vrot.lane.b32.xlu1 %v251_v11, %s1678_s26 }
  0x3d   :  { %516 = vrot.lane.b32.xlu0 %v458_v16, %s1678_s26  ;;  %v357_v16 = vsel %vm352_vm2, %v354_v55, %v356_v9  ;;  %v361_v55 = vrot.slane %v1778_v61, 1 }
  0x3e   :  { %338 = vrot.lane.b32.xlu1 %v259_v29, %s1678_s26  ;;  %v359_v29 = vrot.slane %v1749_v35, 1 }
  0x41   :  { %518 = vrot.lane.b32.xlu0 %v465_v34, %s1678_s26 }
  0x42   :  { %340 = vrot.lane.b32.xlu1 %v271_v38, %s1678_s26  ;;  %v1674_v38 = vld [vmem:[%s2254_s1 + $0x98] sm:$0xff]  }
  0x45   :  { %520 = vrot.lane.b32.xlu0 %v471_v37, %s1678_s26  ;;  %v390_v37 = vsel %vm352_vm2, %v388_v31, %v389_v32  ;;  %v537_v31 = vrot.slane %v1749_v35, 2 }
  0x46   :  { %342 = vrot.lane.b32.xlu1 %v279_v43, %s1678_s26 }
  0x7b   :  { %v499_v58 = vpop.permute.xlu0 %498 }
  0x7c   :  { %v321_v3 = vpop.permute.xlu1 %320  ;;  %v622_v59 = vsel %vm571_vm3, %v355_v60, %v499_v58  ;;  %v391_v60 = vrot.slane %v1785_v4, 1 }
  0x7d   :  { %924 = vmatprep.mubr.bf16.mxu0 %v622_v59  ;;  %v573_v5 = vsel %vm571_vm3, %v1702_v0, %v321_v3  ;;  %v362_v3 = vsel %vm352_vm2, %v359_v29, %v361_v55 }
  0x7e   :  { %925 = vmatmul.mubr.bf16.vlgmr.msra.gmra.mrb[0].mxu0 %v573_v5  ;;  %v392_v59 = vsel %vm352_vm2, %v389_v32, %v391_v60 }
  0x7f   :  { %v523_v11 = vpop.permute.xlu0 %522 }
  0x80   :  { %v345_v14 = vpop.permute.xlu1 %344  ;;  %v670_v17 = vsel %vm571_vm3, %v385_v56, %v523_v11  ;;  %v532_v11 = vrot.slane %v1707_v1, 2 }
  0x81   :  { %1020 = vmatprep.mubr.bf16.mxu1 %v670_v17  ;;  %v609_v12 = vsel %vm571_vm3, %v1716_v6, %v345_v14  ;;  %v358_v6 = vrot.slane %v1741_v30, 1  ;;  %v363_v17 = vrot.slane %v1797_v24, 1 }
  0x82   :  { %1021 = vmatmul.mubr.bf16.vlgmr.msra.gmra.mrb[0].mxu1 %v609_v12 }
  0x83   :  { %1575 = vmatpush3.bf16.msra.mxu1 %v1671_v33  ;;  %v501_v8 = vpop.permute.xlu0 %500  ;;  %v360_v19 = vsel %vm352_vm2, %v358_v6, %v359_v29  ;;  %v536_v29 = vrot.slane %v1741_v30, 2 }
  0x84   :  { %v525_v25 = vpop.permute.xlu1 %524  ;;  %v626_v21 = vsel %vm571_vm3, %v357_v16, %v501_v8  ;;  %1576 = vmatprep.subr.bf16.mxu1 %v1672_v18  ;;  %v533_v8 = vsel %vm530_vm4, %v531_v10, %v532_v11  ;;  %v373_v10 = vrot.slane %v1867_v28, 1 }
  0x85   :  { %932 = vmatprep.mubr.bf16.mxu0 %v626_v21  ;;  %v674_v27 = vsel %vm571_vm3, %v387_v22, %v525_v25  ;;  %v366_v25 = vrot.slane %v1814_v42, 1 }
  0x86   :  { %1028 = vmatprep.mubr.bf16.mxu1 %v674_v27 }
  0x87   :  { %v323_v33 = vpop.permute.xlu0 %322  ;;  %1577 = vmatpush3.bf16.msra.mxu1 %v1672_v18  ;;  %v364_v18 = vrot.slane %v1802_v26, 1 }
  0x88   :  { %v347_v34 = vpop.permute.xlu1 %346  ;;  %v576_v36 = vsel %vm571_vm3, %v1707_v1, %v323_v33  ;;  %1578 = vmatprep.subr.bf16.mxu1 %v1673_v23 }
  0x89   :  { %933 = vmatmul.mubr.bf16.gmra.mrb[4].mxu0 %v576_v36  ;;  %v612_v41 = vsel %vm571_vm3, %v1721_v7, %v347_v34  ;;  %v365_v1 = vsel %vm352_vm2, %v363_v17, %v364_v18  ;;  %v367_v32 = vsel %vm352_vm2, %v364_v18, %v366_v25  ;;  %v551_v17 = vrot.slane %v1867_v28, 2 }
  0x8a   :  { %1029 = vmatmul.mubr.bf16.gmra.mrb[4].mxu1 %v612_v41  ;;  %v368_v41 = vrot.slane %v1826_v51, 1  ;;  %v552_v18 = vrot.slane %v1888_v47, 2 }
  0x8b   :  { %v503_v43 = vpop.permute.xlu0 %502  ;;  %1579 = vmatpush3.bf16.msra.mxu1 %v1673_v23  ;;  %v534_v23 = vrot.slane %v1730_v20, 2  ;;  %v538_v20 = vsel %vm530_vm4, %v536_v29, %v537_v31  ;;  %v559_v29 = vrot.slane %v1947_v39, 2 }
  0x8c   :  { %v527_v46 = vpop.permute.xlu1 %526  ;;  %v630_v52 = vsel %vm571_vm3, %v360_v19, %v503_v43  ;;  %1580 = vmatprep.subr.bf16.mxu1 %v1674_v38  ;;  %v369_v19 = vrot.slane %v1835_v62, 1 }
  0x8d   :  { %940 = vmatprep.mubr.bf16.mxu0 %v630_v52  ;;  %v678_v54 = vsel %vm571_vm3, %v390_v37, %v527_v46  ;;  %v535_v34 = vsel %vm530_vm4, %v532_v11, %v534_v23  ;;  %v541_v46 = vrot.slane %v1797_v24, 2  ;;  %v542_v52 = vrot.slane %v1802_v26, 2 }
  0x8e   :  { %1036 = vmatprep.mubr.bf16.mxu1 %v678_v54  ;;  %v370_v43 = vsel %vm352_vm2, %v368_v41, %v369_v19  ;;  %v549_v11 = vrot.slane %v1852_v13, 2  ;;  %v1677_v41 = vld [vmem:[%s2253_s0 + $0x88] ss:$0 sps:$4 sm:$0x33]  }
  0x8f   :  { %v325_v7 = vpop.permute.xlu0 %324  ;;  %1581 = vmatpush3.bf16.msra.mxu1 %v1674_v38 }
  0x90   :  { %v349_v50 = vpop.permute.xlu1 %348  ;;  %v579_v63 = vsel %vm571_vm3, %v1741_v30, %v325_v7  ;;  %v543_v7 = vsel %vm530_vm4, %v541_v46, %v542_v52 }
  0x91   :  { %941 = vmatmul.mubr.bf16.gmra.mrb[8].mxu0 %v579_v63  ;;  %v615_v58 = vsel %vm571_vm3, %v1758_v40, %v349_v50  ;;  %v371_v50 = vrot.slane %v1852_v13, 1 }
  0x92   :  { %1037 = vmatmul.mubr.bf16.gmra.mrb[8].mxu1 %v615_v58  ;;  %v546_v58 = vrot.slane %v1826_v51, 2 }
  0x93   :  { %v505_v5 = vpop.permute.xlu0 %504 }
  0x94   :  { %v529_v56 = vpop.permute.xlu1 %528  ;;  %v634_v9 = vsel %vm571_vm3, %v362_v3, %v505_v5  ;;  %v547_v3 = vrot.slane %v1835_v62, 2 }
  0x95   :  { %948 = vmatprep.mubr.bf16.mxu0 %v634_v9  ;;  %v682_v14 = vsel %vm571_vm3, %v392_v59, %v529_v56 }
  0x96   :  { %1044 = vmatprep.mubr.bf16.mxu1 %v682_v14  ;;  %v548_v9 = vsel %vm530_vm4, %v546_v58, %v547_v3 }
  0x97   :  { %v327_v12 = vpop.permute.xlu0 %326 }
  0x98   :  { %v351_v16 = vpop.permute.xlu1 %350  ;;  %v582_v22 = vsel %vm571_vm3, %v1749_v35, %v327_v12  ;;  %v539_v35 = vrot.slane %v1778_v61, 2 }
  0x99   :  { %949 = vmatmul.mubr.bf16.gmra.mrb[12].mxu0 %v582_v22  ;;  %v618_v0 = vsel %vm571_vm3, %v1765_v49, %v351_v16  ;;  %v550_v16 = vsel %vm530_vm4, %v547_v3, %v549_v11 }
  0x9a   :  { %1045 = vmatmul.mubr.bf16.gmra.mrb[12].mxu1 %v618_v0  ;;  %v540_v55 = vsel %vm530_vm4, %v537_v31, %v539_v35  ;;  %v567_v35 = vrot.slane %v1765_v49, 2 }
  0x9b   :  { %v507_v21 = vpop.permute.xlu0 %506  ;;  %1582 = vmatprep.mubr.msk.bf16.mxu1 %vm571_vm3, %v533_v8  ;;  %v553_v8 = vsel %vm530_vm4, %v551_v17, %v552_v18 }
  0x9c   :  { %v329_v27 = vpop.permute.xlu1 %328  ;;  %v638_v6 = vsel %vm571_vm3, %v365_v1, %v507_v21  ;;  %v556_v1 = vrot.slane %v1907_v2, 2 }
  0x9d   :  { %956 = vmatprep.mubr.bf16.mxu0 %v638_v6  ;;  %v585_v33 = vsel %vm571_vm3, %v1797_v24, %v329_v27  ;;  %v544_v24 = vrot.slane %v1814_v42, 2  ;;  %v378_v6 = vrot.slane %v1907_v2, 1 }
  0x9f   :  { %v509_v36 = vpop.permute.xlu0 %508  ;;  %v545_v5 = vsel %vm530_vm4, %v542_v52, %v544_v24 }
  0xa0   :  { %v642_v38 = vsel %vm571_vm3, %v367_v32, %v509_v36  ;;  %v331_v30 = vpop.permute.xlu1 %330 }
  0xa1   :  { %957 = vmatmul.mubr.bf16.gmra.mrb[16].mxu0 %v585_v33  ;;  %v588_v54 = vsel %vm571_vm3, %v1802_v26, %v331_v30  ;;  %v372_v26 = vsel %vm352_vm2, %v369_v19, %v371_v50  ;;  %v1676_v33 = vld [vmem:[%s2253_s0 + $0x80] sm:$0xff]   ;;  %v564_v19 = vrot.slane %v1677_v41, 2 }
  0xa2   :  { %1583 = vmatmul.mubr.msk.bf16.vlgmr.msra.gmra.mrb[16].mxu1 %vm571_vm3, %v535_v34  ;;  %964 = vmatprep.mubr.bf16.mxu0 %v642_v38  ;;  %v562_v34 = vrot.slane %v1676_v33, 2 }
  0xa3   :  { %1586 = vmatprep.mubr.msk.bf16.mxu1 %vm571_vm3, %v538_v20  ;;  %v511_v37 = vpop.permute.xlu0 %510 }
  0xa4   :  { %v646_v60 = vsel %vm571_vm3, %v370_v43, %v511_v37  ;;  %v333_v61 = vpop.permute.xlu1 %332  ;;  %v565_v43 = vsel %vm530_vm4, %v562_v34, %v564_v19 }
  0xa5   :  { %v591_v59 = vsel %vm571_vm3, %v1826_v51, %v333_v61  ;;  %v375_v51 = vsel %vm352_vm2, %v373_v10, %v374_v45  ;;  %v554_v45 = vrot.slane %v1900_v57, 2 }
  0xa7   :  { %v513_v63 = vpop.permute.xlu0 %512  ;;  %v555_v21 = vsel %vm530_vm4, %v552_v18, %v554_v45 }
  0xa8   :  { %v650_v56 = vsel %vm571_vm3, %v372_v26, %v513_v63  ;;  %v335_v42 = vpop.permute.xlu1 %334 }
  0xa9   :  { %965 = vmatmul.mubr.bf16.gmra.mrb[20].mxu0 %v588_v54  ;;  %v594_v12 = vsel %vm571_vm3, %v1835_v62, %v335_v42  ;;  %v557_v62 = vrot.slane %v1920_v15, 2 }
  0xaa   :  { %1587 = vmatmul.mubr.msk.bf16.gmra.mrb[20].mxu1 %vm571_vm3, %v540_v55  ;;  %972 = vmatprep.mubr.bf16.mxu0 %v646_v60 }
  0xab   :  { %1590 = vmatprep.mubr.msk.bf16.mxu1 %vm571_vm3, %v543_v7  ;;  %v515_v14 = vpop.permute.xlu0 %514  ;;  %v558_v27 = vsel %vm530_vm4, %v556_v1, %v557_v62  ;;  %v560_v39 = vsel %vm530_vm4, %v557_v62, %v559_v29 }
  0xac   :  { %v654_v22 = vsel %vm571_vm3, %v375_v51, %v515_v14  ;;  %v337_v13 = vpop.permute.xlu1 %336 }
  0xad   :  { %v597_v25 = vsel %vm571_vm3, %v1867_v28, %v337_v13  ;;  %v380_v28 = vsel %vm352_vm2, %v378_v6, %v379_v48 }
  0xaf   :  { %v517_v0 = vpop.permute.xlu0 %516 }
  0xb0   :  { %v658_v23 = vsel %vm571_vm3, %v1998_v44, %v517_v0  ;;  %v339_v57 = vpop.permute.xlu1 %338  ;;  %v1675_v44 = vld [vmem:[%s2253_s0 + $0x78] sm:$0xff]  }
  0xb1   :  { %973 = vmatmul.mubr.bf16.gmra.mrb[24].mxu0 %v591_v59  ;;  %v561_v32 = vrot.slane %v1675_v44, 2  ;;  %v600_v36 = vsel %vm571_vm3, %v1888_v47, %v339_v57  ;;  %v566_v47 = vrot.slane %v1758_v40, 2  ;;  %v569_v40 = vrot.slane %v1785_v4, 2 }
  0xb2   :  { %1591 = vmatmul.mubr.msk.bf16.gmra.mrb[24].mxu1 %vm571_vm3, %v545_v5  ;;  %980 = vmatprep.mubr.bf16.mxu0 %v650_v56 }
  0xb3   :  { %1594 = vmatprep.mubr.msk.bf16.mxu1 %vm571_vm3, %v548_v9  ;;  %v519_v31 = vpop.permute.xlu0 %518  ;;  %v563_v20 = vsel %vm530_vm4, %v561_v32, %v562_v34  ;;  %v568_v52 = vsel %vm530_vm4, %v566_v47, %v567_v35 }
  0xb4   :  { %v662_v38 = vsel %vm571_vm3, %v380_v28, %v519_v31  ;;  %v341_v48 = vpop.permute.xlu1 %340 }
  0xb5   :  { %v603_v37 = vsel %vm571_vm3, %v1907_v2, %v341_v48  ;;  %v570_v2 = vsel %vm530_vm4, %v567_v35, %v569_v40  ;;  %v2186_v35 = vld [vmem:[%s2255_s2] sm:$0xff] }
  0xb7   :  { %v521_v30 = vpop.permute.xlu0 %520 }
  0xb8   :  { %v666_v46 = vsel %vm571_vm3, %v2006_v53, %v521_v30  ;;  %v343_v54 = vpop.permute.xlu1 %342 }
  0xb9   :  { %981 = vmatmul.mubr.bf16.gmra.mrb[28].mxu0 %v594_v12  ;;  %v606_v49 = vsel %vm571_vm3, %v1920_v15, %v343_v54 }
  0xba   :  { %1595 = vmatmul.mubr.msk.bf16.gmra.mrb[28].mxu1 %vm571_vm3, %v550_v16  ;;  %988 = vmatprep.mubr.bf16.mxu0 %v654_v22 }
  0xbb   :  { %1598 = vmatprep.mubr.msk.bf16.mxu1 %vm571_vm3, %v553_v8 }
  0xc1   :  { %989 = vmatmul.mubr.bf16.gmra.mrb[32].mxu0 %v597_v25 }
  0xc2   :  { %1599 = vmatmul.mubr.msk.bf16.gmra.mrb[32].mxu1 %vm571_vm3, %v555_v21  ;;  %996 = vmatprep.mubr.bf16.mxu0 %v658_v23 }
  0xc3   :  { %1602 = vmatprep.mubr.msk.bf16.mxu1 %vm571_vm3, %v558_v27 }
  0xc9   :  { %997 = vmatmul.mubr.bf16.gmra.mrb[36].mxu0 %v600_v36 }
  0xca   :  { %1603 = vmatmul.mubr.msk.bf16.gmra.mrb[36].mxu1 %vm571_vm3, %v560_v39  ;;  %1004 = vmatprep.mubr.bf16.mxu0 %v662_v38 }
  0xcb   :  { %1606 = vmatprep.mubr.msk.bf16.mxu1 %vm571_vm3, %v563_v20 }
  0xd1   :  { %1005 = vmatmul.mubr.bf16.gmra.mrb[40].mxu0 %v603_v37 }
  0xd2   :  { %1607 = vmatmul.mubr.msk.bf16.gmra.mrb[40].mxu1 %vm571_vm3, %v565_v43  ;;  %1012 = vmatprep.mubr.bf16.mxu0 %v666_v46 }
  0xd3   :  { %1610 = vmatprep.mubr.msk.bf16.mxu1 %vm571_vm3, %v568_v52  ;;  %v2191_v52 = vld [vmem:[%s2255_s2 + $0x10] sm:$0xff] }
  0xd9   :  { %1013 = vmatmul.mubr.bf16.gmra.mrb[44].mxu0 %v606_v49 }
  0xda   :  { %1611 = vmatmul.mubr.msk.bf16.gmra.mrb[44].mxu1 %vm571_vm3, %v570_v2  ;;  %v2196_v2 = vld [vmem:[%s2255_s2 + $0x8] sm:$0xff] }
 0x151   :  { %v1458_v53 = vpop.f32.mrb[0].mxu0 }
 0x152   :  { %v1459_v55 = vpop.f32.mrb[1].mxu0 }
 0x153   :  { %v1460_v60 = vadd.f32 %v1459_v55, %v1458_v53  ;;  %v1461_v7 = vpop.f32.mrb[2].mxu0 }
 0x154   :  { %v1462_v50 = vpop.f32.mrb[3].mxu0 }
 0x155   :  { %v1463_v61 = vadd.f32 %v1462_v50, %v1461_v7  ;;  %v1530_v24 = vpop.f32.mrb[0].mxu1 }
 0x156   :  { %v1531_v63 = vpop.f32.mrb[1].mxu1 }
 0x157   :  { %v2167_v26 = vadd.f32 %v1531_v63, %v1530_v24  ;;  %v1533_v58 = vpop.f32.mrb[2].mxu1 }
 0x158   :  { %v1534_v4 = vpop.f32.mrb[3].mxu1 }
 0x159   :  { %v2169_v3 = vadd.f32 %v1534_v4, %v1533_v58 }
 0x15c   :  { %v1464_v15 = vpop.f32.mrb[4].mxu0 }
 0x15d   :  { %v1465_v59 = vpop.f32.mrb[5].mxu0  ;;  %v1536_v5 = vpop.f32.mrb[4].mxu1 }
 0x15e   :  { %v1466_v56 = vadd.f32 %v1465_v59, %v1464_v15  ;;  %v1467_v9 = vpop.f32.mrb[6].mxu0  ;;  %v1537_v10 = vpop.f32.mrb[5].mxu1 }
 0x15f   :  { %v2171_v42 = vadd.f32 %v1537_v10, %v1536_v5  ;;  %v1468_v11 = vpop.f32.mrb[7].mxu0  ;;  %v1539_v14 = vpop.f32.mrb[6].mxu1 }
 0x160   :  { %v1469_v51 = vadd.f32 %v1468_v11, %v1467_v9  ;;  %v1540_v17 = vpop.f32.mrb[7].mxu1 }
 0x161   :  { %v2173_v18 = vadd.f32 %v1540_v17, %v1539_v14 }
 0x164   :  { %v1470_v12 = vpop.f32.mrb[8].mxu0 }
 0x165   :  { %v1471_v16 = vpop.f32.mrb[9].mxu0  ;;  %v1542_v22 = vpop.f32.mrb[8].mxu1 }
 0x166   :  { %v1472_v8 = vadd.f32 %v1471_v16, %v1470_v12  ;;  %v1473_v13 = vpop.f32.mrb[10].mxu0  ;;  %v1543_v45 = vpop.f32.mrb[9].mxu1 }
 0x167   :  { %v2175_v0 = vadd.f32 %v1543_v45, %v1542_v22  ;;  %v1474_v1 = vpop.f32.mrb[11].mxu0  ;;  %v1545_v62 = vpop.f32.mrb[10].mxu1 }
 0x168   :  { %v1475_v25 = vadd.f32 %v1474_v1, %v1473_v13  ;;  %v1546_v21 = vpop.f32.mrb[11].mxu1 }
 0x169   :  { %v2177_v23 = vadd.f32 %v1546_v21, %v1545_v62 }
 0x16c   :  { %v1476_v27 = vpop.f32.mrb[12].mxu0 }
 0x16d   :  { %v1477_v6 = vpop.f32.mrb[13].mxu0  ;;  %v1548_v57 = vpop.f32.mrb[12].mxu1 }
 0x16e   :  { %v1478_v29 = vadd.f32 %v1477_v6, %v1476_v27  ;;  %v1479_v31 = vpop.f32.mrb[14].mxu0  ;;  %v1549_v28 = vpop.f32.mrb[13].mxu1 }
 0x16f   :  { %v2179_v44 = vadd.f32 %v1549_v28, %v1548_v57  ;;  %v1480_v32 = vpop.f32.mrb[15].mxu0  ;;  %v1551_v33 = vpop.f32.mrb[14].mxu1 }
 0x170   :  { %v1481_v34 = vadd.f32 %v1480_v32, %v1479_v31  ;;  %v1552_v36 = vpop.f32.mrb[15].mxu1 }
 0x171   :  { %v2181_v39 = vadd.f32 %v1552_v36, %v1551_v33 }
 0x174   :  { %v1482_v38 = vpop.f32.mrb[16].mxu0 }
 0x175   :  { %v1483_v20 = vpop.f32.mrb[17].mxu0  ;;  %v1584_v48 = vpop.f32.mrb[16].mxu1 }
 0x176   :  { %v1484_v41 = vadd.f32 %v1483_v20, %v1482_v38  ;;  %v1096_v19 = vadd.f32 %v1584_v48, %v1466_v56  ;;  %v1485_v30 = vpop.f32.mrb[18].mxu0  ;;  %v1087_v47 = vpop.f32.mrb[17].mxu1 }
 0x177   :  { %v1088_v37 = vadd.f32 %v1460_v60, %v1087_v47  ;;  %v1486_v43 = vpop.f32.mrb[19].mxu0  ;;  %v1585_v46 = vpop.f32.mrb[18].mxu1  ;;  %v2202_v60 = vld [vmem:[%s2255_s2 + $0x18] sm:$0xff] }
 0x178   :  { %v1487_v54 = vadd.f32 %v1486_v43, %v1485_v30  ;;  %v1099_v40 = vadd.f32 %v1585_v46, %v1469_v51  ;;  %v1090_v49 = vpop.f32.mrb[19].mxu1  ;;  %v1220_v7 = vadd.f32 %v2191_v52, %v1096_v19 }
 0x179   :  { %v1218_v53 = vadd.f32 %v2186_v35, %v1088_v37  ;;  %v1091_v55 = vadd.f32 %v1463_v61, %v1090_v49 }
 0x17a   :  { %v1221_v58 = vadd.f32 %v2202_v60, %v1099_v40  ;;  %v1252_v10 = vmax.f32 %v1220_v7, 0.0 }
 0x17b   :  { %v1219_v50 = vadd.f32 %v2196_v2, %v1091_v55  ;;  %v1250_v63 = vmax.f32 %v1218_v53, 0.0 }
 0x17c   :  { %v1488_v24 = vpop.f32.mrb[20].mxu0  ;;  %v1253_v13 = vmax.f32 %v1221_v58, 0.0 }
 0x17d   :  { %v1251_v4 = vmax.f32 %v1219_v50, 0.0  ;;  %v1489_v15 = vpop.f32.mrb[21].mxu0  ;;  %v1588_v59 = vpop.f32.mrb[20].mxu1 }
 0x17e   :  { %v1490_v5 = vadd.f32 %v1489_v15, %v1488_v24  ;;  %v1112_v56 = vadd.f32 %v1588_v59, %v1478_v29  ;;  %v1491_v9 = vpop.f32.mrb[22].mxu0  ;;  %v1103_v61 = vpop.f32.mrb[21].mxu1 }
 0x17f   :  { %v1282_v11 = vmax.f32 %v1250_v63, %v1251_v4  ;;  %v1104_v14 = vadd.f32 %v1472_v8, %v1103_v61  ;;  %v1492_v51 = vpop.f32.mrb[23].mxu0  ;;  %v1589_v17 = vpop.f32.mrb[22].mxu1 }
 0x180   :  { %v1493_v12 = vadd.f32 %v1492_v51, %v1491_v9  ;;  %v1115_v16 = vadd.f32 %v1589_v17, %v1481_v34  ;;  %v1106_v22 = vpop.f32.mrb[23].mxu1  ;;  %v1224_v27 = vadd.f32 %v2191_v52, %v1112_v56 }
 0x181   :  { %v1283_v45 = vmax.f32 %v1282_v11, %v1252_v10  ;;  %v1222_v1 = vadd.f32 %v2186_v35, %v1104_v14  ;;  %v1107_v62 = vadd.f32 %v1475_v25, %v1106_v22 }
 0x182   :  { %v1225_v8 = vadd.f32 %v2202_v60, %v1115_v16  ;;  %v1256_v19 = vmax.f32 %v1224_v27, 0.0 }
 0x183   :  { %v1284_v21 = vmax.f32 %v1283_v45, %v1253_v13  ;;  %v1223_v6 = vadd.f32 %v2196_v2, %v1107_v62  ;;  %v1254_v31 = vmax.f32 %v1222_v1, 0.0 }
 0x184   :  { %v1494_v57 = vpop.f32.mrb[24].mxu0  ;;  %v1257_v49 = vmax.f32 %v1225_v8, 0.0 }
 0x185   :  { %v1285_v29 = vrot.slane %v1284_v21, 4  ;;  %v1255_v28 = vmax.f32 %v1223_v6, 0.0  ;;  %v1495_v32 = vpop.f32.mrb[25].mxu0  ;;  %v1592_v33 = vpop.f32.mrb[24].mxu1 }
 0x186   :  { %v1496_v34 = vadd.f32 %v1495_v32, %v1494_v57  ;;  %v1128_v36 = vadd.f32 %v1592_v33, %v1490_v5  ;;  %v1497_v38 = vpop.f32.mrb[26].mxu0  ;;  %v1119_v20 = vpop.f32.mrb[25].mxu1 }
 0x187   :  { %v1286_v48 = vmax.f32 %v1284_v21, %v1285_v29  ;;  %v1291_v25 = vmax.f32 %v1254_v31, %v1255_v28  ;;  %v1120_v30 = vadd.f32 %v1484_v41, %v1119_v20  ;;  %v1498_v47 = vpop.f32.mrb[27].mxu0  ;;  %v1593_v37 = vpop.f32.mrb[26].mxu1 }
 0x188   :  { %v1499_v43 = vadd.f32 %v1498_v47, %v1497_v38  ;;  %v1131_v46 = vadd.f32 %v1593_v37, %v1493_v12  ;;  %v1122_v40 = vpop.f32.mrb[27].mxu1  ;;  %v1228_v63 = vadd.f32 %v2191_v52, %v1128_v36 }
 0x189   :  { %v1292_v53 = vmax.f32 %v1291_v25, %v1256_v19  ;;  %v1226_v55 = vadd.f32 %v2186_v35, %v1120_v30  ;;  %v1123_v7 = vadd.f32 %v1487_v54, %v1122_v40  ;;  %v1287_v50 = vrot.slane %v1286_v48, 2 }
 0x18a   :  { %v1229_v4 = vadd.f32 %v2202_v60, %v1131_v46  ;;  %v1260_v54 = vmax.f32 %v1228_v63, 0.0 }
 0x18b   :  { %v1293_v24 = vmax.f32 %v1292_v53, %v1257_v49  ;;  %v1227_v58 = vadd.f32 %v2196_v2, %v1123_v7  ;;  %v1258_v59 = vmax.f32 %v1226_v55, 0.0  ;;  %v1288_v61 = vmax.f32 %v1286_v48, %v1287_v50 }
 0x18c   :  { %v1500_v15 = vpop.f32.mrb[28].mxu0  ;;  %v1261_v13 = vmax.f32 %v1229_v4, 0.0 }
 0x18d   :  { %v1294_v41 = vrot.slane %v1293_v24, 4  ;;  %v1259_v5 = vmax.f32 %v1227_v58, 0.0  ;;  %v1501_v56 = vpop.f32.mrb[29].mxu0  ;;  %v1596_v9 = vpop.f32.mrb[28].mxu1  ;;  %v1289_v29 = vrot.slane %v1288_v61, 1 }
 0x18e   :  { %v1502_v10 = vadd.f32 %v1501_v56, %v1500_v15  ;;  %v1503_v11 = vpop.f32.mrb[30].mxu0  ;;  %v1135_v14 = vpop.f32.mrb[29].mxu1 }
 0x18f   :  { %v1295_v51 = vmax.f32 %v1293_v24, %v1294_v41  ;;  %v1300_v17 = vmax.f32 %v1258_v59, %v1259_v5  ;;  %v1136_v12 = vadd.f32 %v1496_v34, %v1135_v14  ;;  %v1504_v16 = vpop.f32.mrb[31].mxu0  ;;  %v1597_v22 = vpop.f32.mrb[30].mxu1  ;;  %v1290_v47 = vmax.f32 %v1288_v61, %v1289_v29 }
 0x190   :  { %v1144_v45 = vadd.f32 %v1596_v9, %v1502_v10  ;;  %v1505_v1 = vadd.f32 %v1504_v16, %v1503_v11  ;;  %v1138_v62 = vpop.f32.mrb[31].mxu1 }
 0x191   :  { %v1296_v21 = vrot.slane %v1295_v51, 2  ;;  %v1301_v27 = vmax.f32 %v1300_v17, %v1260_v54  ;;  %v1230_v6 = vadd.f32 %v2186_v35, %v1136_v12  ;;  %v1139_v57 = vadd.f32 %v1499_v43, %v1138_v62 }
 0x192   :  { %v1147_v31 = vadd.f32 %v1597_v22, %v1505_v1  ;;  %v1232_v32 = vadd.f32 %v2191_v52, %v1144_v45 }
 0x193   :  { %v1297_v8 = vmax.f32 %v1295_v51, %v1296_v21  ;;  %v1302_v28 = vmax.f32 %v1301_v27, %v1261_v13  ;;  %v1231_v33 = vadd.f32 %v2196_v2, %v1139_v57  ;;  %v1262_v34 = vmax.f32 %v1230_v6, 0.0 }
 0x194   :  { %v1506_v36 = vpop.f32.mrb[32].mxu0  ;;  %v1233_v48 = vadd.f32 %v2202_v60, %v1147_v31  ;;  %v1264_v53 = vmax.f32 %v1232_v32, 0.0 }
 0x195   :  { %v1298_v38 = vrot.slane %v1297_v8, 1  ;;  %v1303_v20 = vrot.slane %v1302_v28, 4  ;;  %v1263_v19 = vmax.f32 %v1231_v33, 0.0  ;;  %v1507_v25 = vpop.f32.mrb[33].mxu0  ;;  %v1600_v30 = vpop.f32.mrb[32].mxu1 }
 0x196   :  { %v1508_v37 = vadd.f32 %v1507_v25, %v1506_v36  ;;  %v1509_v43 = vpop.f32.mrb[34].mxu0  ;;  %v1151_v46 = vpop.f32.mrb[33].mxu1  ;;  %v1265_v41 = vmax.f32 %v1233_v48, 0.0 }
 0x197   :  { %v1299_v40 = vmax.f32 %v1297_v8, %v1298_v38  ;;  %v1304_v49 = vmax.f32 %v1302_v28, %v1303_v20  ;;  %v1309_v55 = vmax.f32 %v1262_v34, %v1263_v19  ;;  %v1510_v7 = vpop.f32.mrb[35].mxu0  ;;  %v1601_v50 = vpop.f32.mrb[34].mxu1 }
 0x198   :  { %v1152_v24 = vadd.f32 %v1508_v37, %v1151_v46  ;;  %v1511_v63 = vadd.f32 %v1510_v7, %v1509_v43  ;;  %v1154_v58 = vpop.f32.mrb[35].mxu1 }
 0x199   :  { %v1363_v4 = vsel %vm1362_vm5, %v1299_v40, %v1290_v47  ;;  %v1305_v15 = vrot.slane %v1304_v49, 2  ;;  %v1310_v59 = vmax.f32 %v1309_v55, %v1264_v53 }
 0x19a   :  { %v1234_v5 = vadd.f32 %v2186_v35, %v1152_v24  ;;  %v1155_v56 = vadd.f32 %v1511_v63, %v1154_v58 }
 0x19b   :  { %v1306_v9 = vmax.f32 %v1304_v49, %v1305_v15  ;;  %v1311_v61 = vmax.f32 %v1310_v59, %v1265_v41 }
 0x19c   :  { %v1235_v10 = vadd.f32 %v2196_v2, %v1155_v56  ;;  %v1512_v11 = vpop.f32.mrb[36].mxu0  ;;  %v1266_v12 = vmax.f32 %v1234_v5, 0.0 }
 0x19d   :  { %v1307_v14 = vrot.slane %v1306_v9, 1  ;;  %v1312_v51 = vrot.slane %v1311_v61, 4  ;;  %v1513_v54 = vpop.f32.mrb[37].mxu0  ;;  %v2221_v17 = vpop.f32.mrb[36].mxu1 }
 0x19e   :  { %v1267_v16 = vmax.f32 %v1235_v10, 0.0  ;;  %v1514_v22 = vadd.f32 %v1513_v54, %v1512_v11  ;;  %v1515_v13 = vpop.f32.mrb[38].mxu0  ;;  %v1167_v45 = vpop.f32.mrb[37].mxu1 }
 0x19f   :  { %v1308_v1 = vmax.f32 %v1306_v9, %v1307_v14  ;;  %v1313_v62 = vmax.f32 %v1311_v61, %v1312_v51  ;;  %v1516_v21 = vpop.f32.mrb[39].mxu0  ;;  %v2223_v27 = vpop.f32.mrb[38].mxu1 }
 0x1a0   :  { %v1318_v6 = vmax.f32 %v1266_v12, %v1267_v16  ;;  %v1160_v57 = vadd.f32 %v1600_v30, %v1514_v22  ;;  %v1517_v29 = vadd.f32 %v1516_v21, %v1515_v13  ;;  %v1170_v31 = vpop.f32.mrb[39].mxu1 }
 0x1a1   :  { %v1365_v8 = vsel %vm1364_vm6, %v1308_v1, %v1363_v4  ;;  %v1314_v28 = vrot.slane %v1313_v62, 2 }
 0x1a2   :  { %v1236_v32 = vadd.f32 %v2191_v52, %v1160_v57  ;;  %v1163_v33 = vadd.f32 %v1601_v50, %v1517_v29 }
 0x1a3   :  { %v1315_v34 = vmax.f32 %v1313_v62, %v1314_v28 }
 0x1a4   :  { %v1268_v36 = vmax.f32 %v1236_v32, 0.0  ;;  %v1237_v38 = vadd.f32 %v2202_v60, %v1163_v33  ;;  %v1518_v20 = vpop.f32.mrb[40].mxu0 }
 0x1a5   :  { %v1316_v48 = vrot.slane %v1315_v34, 1  ;;  %v1519_v19 = vpop.f32.mrb[41].mxu0  ;;  %v1608_v25 = vpop.f32.mrb[40].mxu1 }
 0x1a6   :  { %v1319_v47 = vmax.f32 %v1318_v6, %v1268_v36  ;;  %v1269_v37 = vmax.f32 %v1237_v38, 0.0  ;;  %v1520_v43 = vadd.f32 %v1519_v19, %v1518_v20  ;;  %v1192_v30 = vadd.f32 %v1608_v25, %v2171_v42  ;;  %v1521_v46 = vpop.f32.mrb[42].mxu0  ;;  %v1183_v40 = vpop.f32.mrb[41].mxu1 }
 0x1a7   :  { %v1317_v49 = vmax.f32 %v1315_v34, %v1316_v48  ;;  %v1184_v53 = vadd.f32 %v2167_v26, %v1183_v40  ;;  %v1522_v55 = vpop.f32.mrb[43].mxu0  ;;  %v1609_v7 = vpop.f32.mrb[42].mxu1 }
 0x1a8   :  { %v1320_v50 = vmax.f32 %v1319_v47, %v1269_v37  ;;  %v1168_v24 = vadd.f32 %v1520_v43, %v1167_v45  ;;  %v1523_v63 = vadd.f32 %v1522_v55, %v1521_v46  ;;  %v1186_v58 = vpop.f32.mrb[43].mxu1  ;;  %v1195_v41 = vadd.f32 %v1609_v7, %v2173_v18 }
 0x1a9   :  { %v1367_v4 = vsel %vm1366_vm7, %v1317_v49, %v1365_v8  ;;  %v1242_v15 = vadd.f32 %v2186_v35, %v1184_v53  ;;  %v1187_v59 = vadd.f32 %v2169_v3, %v1186_v58  ;;  %v1244_v26 = vadd.f32 %v2191_v52, %v1192_v30 }
 0x1aa   :  { %v1321_v42 = vrot.slane %v1320_v50, 4  ;;  %v1238_v5 = vadd.f32 %v2186_v35, %v1168_v24  ;;  %v1171_v56 = vadd.f32 %v1523_v63, %v1170_v31  ;;  %v1245_v11 = vadd.f32 %v2202_v60, %v1195_v41 }
 0x1ab   :  { %v1243_v9 = vadd.f32 %v2196_v2, %v1187_v59  ;;  %v1274_v54 = vmax.f32 %v1242_v15, 0.0  ;;  %v1276_v21 = vmax.f32 %v1244_v26, 0.0 }
 0x1ac   :  { %v1322_v61 = vmax.f32 %v1320_v50, %v1321_v42  ;;  %v1239_v10 = vadd.f32 %v2196_v2, %v1171_v56  ;;  %v1524_v14 = vpop.f32.mrb[44].mxu0  ;;  %v1270_v51 = vmax.f32 %v1238_v5, 0.0  ;;  %v1277_v32 = vmax.f32 %v1245_v11, 0.0 }
 0x1ad   :  { %v1275_v12 = vmax.f32 %v1243_v9, 0.0  ;;  %v1525_v18 = vpop.f32.mrb[45].mxu0  ;;  %v1612_v16 = vpop.f32.mrb[44].mxu1 }
 0x1ae   :  { %v1323_v3 = vrot.slane %v1322_v61, 2  ;;  %v1271_v22 = vmax.f32 %v1239_v10, 0.0  ;;  %v1526_v13 = vadd.f32 %v1525_v18, %v1524_v14  ;;  %v1208_v45 = vadd.f32 %v1612_v16, %v2179_v44  ;;  %v1527_v1 = vpop.f32.mrb[46].mxu0  ;;  %v1199_v62 = vpop.f32.mrb[45].mxu1 }
 0x1af   :  { %v1336_v6 = vmax.f32 %v1274_v54, %v1275_v12  ;;  %v1200_v57 = vadd.f32 %v2175_v0, %v1199_v62  ;;  %v1528_v29 = vpop.f32.mrb[47].mxu0  ;;  %v1613_v31 = vpop.f32.mrb[46].mxu1 }
 0x1b0   :  { %v1324_v8 = vmax.f32 %v1322_v61, %v1323_v3  ;;  %v1327_v28 = vmax.f32 %v1270_v51, %v1271_v22  ;;  %v1176_v33 = vadd.f32 %v2221_v17, %v1526_v13  ;;  %v1202_v34 = vpop.f32.mrb[47].mxu1  ;;  %v1529_v20 = vadd.f32 %v1528_v29, %v1527_v1 }
 0x1b1   :  { %v1337_v36 = vmax.f32 %v1336_v6, %v1276_v21  ;;  %v1246_v38 = vadd.f32 %v2186_v35, %v1200_v57  ;;  %v1211_v44 = vadd.f32 %v1613_v31, %v2181_v39  ;;  %v1203_v25 = vadd.f32 %v2177_v23, %v1202_v34 }
 0x1b2   :  { %v1325_v48 = vrot.slane %v1324_v8, 1  ;;  %v1240_v19 = vadd.f32 %v2191_v52, %v1176_v33  ;;  %v1179_v47 = vadd.f32 %v2223_v27, %v1529_v20  ;;  %v1248_v17 = vadd.f32 %v2191_v52, %v1208_v45 }
 0x1b3   :  { %v1338_v0 = vmax.f32 %v1337_v36, %v1277_v32  ;;  %v1247_v30 = vadd.f32 %v2196_v2, %v1203_v25  ;;  %v1278_v35 = vmax.f32 %v1246_v38, 0.0  ;;  %v1249_v53 = vadd.f32 %v2202_v60, %v1211_v44 }
 0x1b4   :  { %v1326_v37 = vmax.f32 %v1324_v8, %v1325_v48  ;;  %v1272_v43 = vmax.f32 %v1240_v19, 0.0  ;;  %v1241_v40 = vadd.f32 %v2202_v60, %v1179_v47  ;;  %v1280_v50 = vmax.f32 %v1248_v17, 0.0 }
 0x1b5   :  { %v1339_v46 = vrot.slane %v1338_v0, 4  ;;  %v1279_v55 = vmax.f32 %v1247_v30, 0.0  ;;  %v1281_v58 = vmax.f32 %v1249_v53, 0.0 }
 0x1b6   :  { %v1369_v39 = vsel %vm1368_vm8, %v1326_v37, %v1367_v4  ;;  %v1328_v49 = vmax.f32 %v1327_v28, %v1272_v43  ;;  %v1273_v7 = vmax.f32 %v1241_v40, 0.0 }
 0x1b7   :  { %v1340_v23 = vmax.f32 %v1338_v0, %v1339_v46  ;;  %v1345_v24 = vmax.f32 %v1278_v35, %v1279_v55 }
 0x1b8   :  { %v1329_v27 = vmax.f32 %v1328_v49, %v1273_v7 }
 0x1b9   :  { %v1341_v63 = vrot.slane %v1340_v23, 2  ;;  %v1346_v15 = vmax.f32 %v1345_v24, %v1280_v50 }
 0x1ba   :  { %v1330_v52 = vrot.slane %v1329_v27, 4 }
 0x1bb   :  { %v1347_v41 = vmax.f32 %v1346_v15, %v1281_v58  ;;  %v1342_v59 = vmax.f32 %v1340_v23, %v1341_v63 }
 0x1bc   :  { %v1331_v2 = vmax.f32 %v1329_v27, %v1330_v52 }
 0x1bd   :  { %v1348_v42 = vrot.slane %v1347_v41, 4  ;;  %v1343_v26 = vrot.slane %v1342_v59, 1 }
 0x1be   :  { %v1332_v5 = vrot.slane %v1331_v2, 2 }
 0x1bf   :  { %v1349_v56 = vmax.f32 %v1347_v41, %v1348_v42  ;;  %v1344_v11 = vmax.f32 %v1342_v59, %v1343_v26 }
 0x1c0   :  { %v1333_v4 = vmax.f32 %v1331_v2, %v1332_v5 }
 0x1c1   :  { %v1350_v9 = vrot.slane %v1349_v56, 2 }
 0x1c2   :  { %v1334_v60 = vrot.slane %v1333_v4, 1 }
 0x1c3   :  { %v1351_v61 = vmax.f32 %v1349_v56, %v1350_v9 }
 0x1c4   :  { %v1335_v10 = vmax.f32 %v1333_v4, %v1334_v60 }
 0x1c5   :  { %v1352_v14 = vrot.slane %v1351_v61, 1 }
 0x1c6   :  { %v1371_v51 = vsel %vm1370_vm9, %v1335_v10, %v1369_v39 }
 0x1c7   :  { %v1373_v54 = vsel %vm1372_vm10, %v1344_v11, %v1371_v51  ;;  %v1353_v12 = vmax.f32 %v1351_v61, %v1352_v14 }
 0x1c9   :  { %v1375_v18 = vsel %vm1374_vm11, %v1353_v12, %v1373_v54 }
 0x1ca   :  { %1377 = vst [vmem:[%s2256_s3] sm:$0xff] %v1375_v18 }

</bundles_post_ra>
